<compile_context>
chip_gen: v7x
topology: tpu7x:2x2x1
jax: 0.10.0
libtpu: 0.0.40
codegen_flags: <defaults>
</compile_context>

<pallas_src>
import jax
import jax.numpy as jnp
from jax.experimental import pallas as pl
from jax.experimental.pallas import tpu as pltpu

BN_EPS = 1e-5


# ---------------------------------------------------------------------------
# Per-TPU-generation tile caps / VMEM limits for the two HBM-bound passes.
# ---------------------------------------------------------------------------
def _chip_config():
    try:
        kind = jax.devices()[0].device_kind.lower()
    except Exception:
        kind = ""
    if ("v5" in kind) or ("v4" in kind) or ("v3" in kind) or ("v2" in kind):
        # v5e: 16 MiB scoped-VMEM default, ~0.82 TB/s HBM.  (256, 2048) f32
        # pass-3 tiles are already ~93% of roofline; stay inside the default.
        return dict(rt_cap=256, lt1_cap=4096, lt3_cap=2048, vmem_limit=None)
    if "v6" in kind:
        # v6e: 128 MiB physical VMEM -> room for bigger tiles.
        return dict(rt_cap=256, lt1_cap=8192, lt3_cap=4096, vmem_limit=64 << 20)
    # v7x (and unknown): 64 MiB physical VMEM, ~3.2 TB/s HBM -> bigger per-step
    # blocks to amortize the ~0.35 us/step overhead; explicit 48 MiB limit
    # keeps 2x(x) + 2x(out) buffers comfortably under physical capacity.
    return dict(rt_cap=256, lt1_cap=8192, lt3_cap=4096, vmem_limit=48 << 20)


def _pick_tile(dim, multiple, cap):
    """Largest tile <= cap that is a multiple of `multiple`, preferring (when one
    exists near the cap) a divisor of `dim` so edge blocks stay full.  For
    dim <= multiple the full dim is returned (always a legal block shape)."""
    if dim <= multiple:
        return dim
    cap = min(cap, dim)
    best = cap - cap % multiple
    t = best
    while t >= multiple and 2 * t > best:      # only look for divisors near the cap
        if dim % t == 0:
            return t
        t -= multiple
    return max(best, multiple)


# ---------------------------------------------------------------------------
# Pass 1: tiled reduction — per-row sum of |x| over the lane (L) axis.
# Lane-dense (rt, chunk) accumulator; cross-lane reduce only at the final step.
# ---------------------------------------------------------------------------
def _make_abs_sum_kernel(L, lt, n_lane_steps):
    chunk = 128 if (lt >= 128 and lt % 128 == 0) else lt
    n_chunks = lt // chunk
    needs_mask = (L % lt) != 0                 # partial last lane block

    def kernel(x_ref, sum_ref, acc_ref):
        k = pl.program_id(1)

        @pl.when(k == 0)
        def _():
            acc_ref[...] = jnp.zeros_like(acc_ref)

        x = jnp.abs(x_ref[...].astype(jnp.float32))
        if needs_mask:
            lane = jax.lax.broadcasted_iota(jnp.int32, x.shape, 1) + k * lt
            x = jnp.where(lane < L, x, 0.0)

        # Lane-aligned 128-wide VPU adds each step; keeps pass 1 on the
        # vld/VPU path (no per-step XLU reduce, no masked 1-lane stores).
        acc = acc_ref[...]
        for c in range(n_chunks):
            acc = acc + x[:, c * chunk:(c + 1) * chunk]
        acc_ref[...] = acc

        @pl.when(k == n_lane_steps - 1)
        def _():
            sum_ref[...] = jnp.sum(acc_ref[...], axis=-1, keepdims=True)

    return kernel, chunk


# ---------------------------------------------------------------------------
# Pass 2: gating MLP micro-kernel.  Runs ONCE on the full (N, C) tensor because
# BatchNorm1d (training mode) needs batch statistics over the whole N axis.
# avg = sums * (1/L) is folded in here.  Weights arrive pre-transposed (W.T).
# Unblocked is fine while N*C*4 B + 2*C*C*4 B stays well under the VMEM limit.
# ---------------------------------------------------------------------------
def _make_gate_kernel(inv_l):
    def kernel(sums_ref, w1t_ref, b1_ref, g_ref, be_ref, w2t_ref, b2_ref, thr_ref):
        avg = sums_ref[...] * inv_l                                          # (N, C)

        # fc[0]: Linear(C, C)
        h = jnp.dot(avg, w1t_ref[...], preferred_element_type=jnp.float32) + b1_ref[...]

        # fc[1]: BatchNorm1d(C), training-mode batch stats (biased variance)
        mu = jnp.mean(h, axis=0, keepdims=True)
        var = jnp.mean(jnp.square(h - mu), axis=0, keepdims=True)
        h = (h - mu) * jax.lax.rsqrt(var + BN_EPS) * g_ref[...] + be_ref[...]

        # fc[2]: ReLU;  fc[3]: Linear(C, C);  fc[4]: Sigmoid; then thr = avg * s
        h = jnp.maximum(h, 0.0)
        h = jnp.dot(h, w2t_ref[...], preferred_element_type=jnp.float32) + b2_ref[...]
        thr_ref[...] = avg * jax.nn.sigmoid(h)

    return kernel


# ---------------------------------------------------------------------------
# Pass 3: tiled elementwise soft threshold.
#   out = x - clip(x, -thr, thr)  ==  sign(x) * max(|x| - thr, 0)   (thr >= 0)
# Computed in x's native dtype (no f32 upcast of the streamed operand).
# ---------------------------------------------------------------------------
def _soft_threshold_kernel(x_ref, thr_ref, o_ref):
    x = x_ref[...]
    t = thr_ref[...].astype(x.dtype)                                         # (rt, 1)
    o_ref[...] = (x - jnp.clip(x, -t, t)).astype(o_ref.dtype)


def shrinkage(x, w1, b1, gamma, beta, w2, b2):
    """x: (N, C, L); biases / BN params (1, C); weights (C, C) (PyTorch layout)."""
    N, C, L = x.shape
    R = N * C
    x2 = x.reshape(R, L)                              # lane-dense (rows, L) slab

    cfg = _chip_config()
    itemsize = jnp.dtype(x.dtype).itemsize
    sub_mult = max(8, 32 // itemsize)                 # 8 f32 / 16 bf16 / 32 int8

    # Row tile: keep grid_r >= 2 when possible so the "parallel" row axis still
    # shards across both TensorCores on v7x.
    rt_cap = cfg["rt_cap"]
    if R >= 2 * sub_mult:
        rt_cap = min(rt_cap, max((R // 2) // sub_mult * sub_mult, sub_mult))
    rt = _pick_tile(R, sub_mult, rt_cap)
    grid_r = pl.cdiv(R, rt)

    # Pass 1 streams a single read-only operand -> it can afford larger lane
    # tiles than pass 3 (which double-buffers both x and out).
    lt1 = _pick_tile(L, 128, cfg["lt1_cap"])
    lt3 = _pick_tile(L, 128, cfg["lt3_cap"])
    grid_l1 = pl.cdiv(L, lt1)
    grid_l3 = pl.cdiv(L, lt3)

    # ----- pass 1: tiled |x| row sums over L --------------------------------
    abs_sum_kernel, chunk = _make_abs_sum_kernel(L, lt1, grid_l1)
    sums = pl.pallas_call(
        abs_sum_kernel,
        out_shape=jax.ShapeDtypeStruct((R, 1), jnp.float32),
        grid=(grid_r, grid_l1),
        in_specs=[pl.BlockSpec((rt, lt1), lambda i, k: (i, k))],
        out_specs=pl.BlockSpec((rt, 1), lambda i, k: (i, 0)),
        scratch_shapes=[pltpu.VMEM((rt, chunk), jnp.float32)],
        compiler_params=pltpu.CompilerParams(
            dimension_semantics=("parallel", "arbitrary"),
            vmem_limit_bytes=cfg["vmem_limit"]),
    )(x2)

    # ----- pass 2: gating MLP (tiny; full batch for BN statistics) ----------
    vmem = pl.BlockSpec(memory_space=pltpu.MemorySpace.VMEM)
    thr = pl.pallas_call(
        _make_gate_kernel(1.0 / L),
        out_shape=jax.ShapeDtypeStruct((N, C), jnp.float32),
        in_specs=[vmem] * 7,
        out_specs=vmem,
    )(sums.reshape(N, C), w1.T, b1, gamma, beta, w2.T, b2)   # weights pre-transposed
    thr2 = thr.reshape(R, 1)

    # ----- pass 3: tiled elementwise soft-threshold stream -------------------
    out2 = pl.pallas_call(
        _soft_threshold_kernel,
        out_shape=jax.ShapeDtypeStruct((R, L), x.dtype),
        grid=(grid_r, grid_l3),
        in_specs=[pl.BlockSpec((rt, lt3), lambda i, j: (i, j)),
                  pl.BlockSpec((rt, 1), lambda i, j: (i, 0))],
        out_specs=pl.BlockSpec((rt, lt3), lambda i, j: (i, j)),
        compiler_params=pltpu.CompilerParams(
            dimension_semantics=("parallel", "parallel"),
            vmem_limit_bytes=cfg["vmem_limit"]),
    )(x2, thr2)

    return out2.reshape(N, C, L)


def shrinkage_ref(x, w1, b1, gamma, beta, w2, b2):
    x_abs = jnp.abs(x)
    avg = jnp.mean(x_abs, axis=-1)
    h = avg @ w1.T + b1
    mu = jnp.mean(h, axis=0, keepdims=True)
    var = jnp.mean(jnp.square(h - mu), axis=0, keepdims=True)
    h = (h - mu) / jnp.sqrt(var + BN_EPS) * gamma + beta
    h = jnp.maximum(h, 0.0)
    h = h @ w2.T + b2
    scale = jax.nn.sigmoid(h)
    thr = (avg * scale)[:, :, None]
    return jnp.sign(x) * jnp.maximum(x_abs - thr, 0.0)


def _make_params(key, C):
    k1, k2, k3, k4 = jax.random.split(key, 4)
    bound = 1.0 / jnp.sqrt(jnp.float32(C))
    w1 = jax.random.uniform(k1, (C, C), jnp.float32, -bound, bound)
    b1 = jax.random.uniform(k2, (1, C), jnp.float32, -bound, bound)
    w2 = jax.random.uniform(k3, (C, C), jnp.float32, -bound, bound)
    b2 = jax.random.uniform(k4, (1, C), jnp.float32, -bound, bound)
    gamma = jnp.ones((1, C), jnp.float32)      # BatchNorm1d default affine init
    beta = jnp.zeros((1, C), jnp.float32)
    return w1, b1, gamma, beta, w2, b2


if __name__ == "__main__":
    key = jax.random.PRNGKey(0)

    # --- small demo shape consistent with the module (channel=4, gap_size=1) ---
    kx, kp = jax.random.split(key)
    N, C, L = 2, 4, 16
    x = jax.random.normal(kx, (N, C, L), dtype=jnp.float32)
    params = _make_params(kp, C)

    out = jax.block_until_ready(shrinkage(x, *params))
    ref = shrinkage_ref(x, *params)
    assert out.shape == x.shape and out.dtype == x.dtype
    assert jnp.allclose(out, ref, atol=1e-5, rtol=1e-5), "mismatch vs reference (small)"

    # --- larger, aligned shape exercising the tiled / pipelined path ---
    kx2, kp2 = jax.random.split(jax.random.PRNGKey(1))
    N2, C2, L2 = 64, 8, 4096                   # R=512 -> 2 row tiles
    x2 = jax.random.normal(kx2, (N2, C2, L2), dtype=jnp.float32)
    params2 = _make_params(kp2, C2)

    out2 = jax.block_until_ready(shrinkage(x2, *params2))
    ref2 = shrinkage_ref(x2, *params2)
    assert out2.shape == x2.shape and out2.dtype == x2.dtype
    assert jnp.allclose(out2, ref2, atol=1e-4, rtol=1e-4), "mismatch vs reference (tiled)"

    # --- unaligned L exercising the cdiv grid + in-kernel lane masking path ---
    kx3, kp3 = jax.random.split(jax.random.PRNGKey(2))
    N3, C3, L3 = 4, 4, 300                     # L not a multiple of 128
    x3 = jax.random.normal(kx3, (N3, C3, L3), dtype=jnp.float32)
    params3 = _make_params(kp3, C3)

    out3 = jax.block_until_ready(shrinkage(x3, *params3))
    ref3 = shrinkage_ref(x3, *params3)
    assert out3.shape == x3.shape and out3.dtype == x3.dtype
    assert jnp.allclose(out3, ref3, atol=1e-5, rtol=1e-5), "mismatch vs reference (masked)"

    print("KERNEL_OK")
</pallas_src>

<mosaic_0001>
module attributes {stable_mosaic.version = 11 : i64} {
  func.func @kernel(%arg0: i32, %arg1: i32, %arg2: memref<8x16xf32, #tpu.memory_space<vmem>>, %arg3: memref<8x1xf32, #tpu.memory_space<vmem>>, %arg4: memref<8x16xf32, #tpu.memory_space<vmem>>) attributes {dimension_semantics = [#tpu.dimension_semantics<parallel>, #tpu.dimension_semantics<arbitrary>], iteration_bounds = array<i64: 1, 1>, scalar_prefetch = 0 : i64, scratch_operands = 1 : i64, tpu.core_type = #tpu.core_type<tc>, window_params = [{transform_indices = @transform_0, window_bounds = array<i64: 8, 16>}, {transform_indices = @transform_1, window_bounds = array<i64: 8, 1>}]} {
    %c0_i32 = arith.constant 0 : i32
    %0 = arith.cmpi eq, %arg1, %c0_i32 : i32
    %1 = arith.extui %0 : i1 to i32
    %c0_i32_0 = arith.constant 0 : i32
    %2 = arith.cmpi ne, %1, %c0_i32_0 : i32
    scf.if %2 {
      %cst = arith.constant 0.000000e+00 : f32
      %11 = vector.broadcast %cst : f32 to vector<8x16xf32>
      %c0_8 = arith.constant 0 : index
      %c0_9 = arith.constant 0 : index
      %12 = vector.load %arg4[%c0_8, %c0_9] : memref<8x16xf32, #tpu.memory_space<vmem>>, vector<8x16xf32>
      tpu.vector_store %arg4[%c0_8, %c0_9], %11 {strides = array<i32>} : memref<8x16xf32, #tpu.memory_space<vmem>>, vector<8x16xf32>,
    } else {
    }
    %c0 = arith.constant 0 : index
    %c0_1 = arith.constant 0 : index
    %3 = vector.load %arg2[%c0, %c0_1] : memref<8x16xf32, #tpu.memory_space<vmem>>, vector<8x16xf32>
    %4 = math.absf %3 : vector<8x16xf32>
    %c0_2 = arith.constant 0 : index
    %c0_3 = arith.constant 0 : index
    %5 = vector.load %arg4[%c0_2, %c0_3] : memref<8x16xf32, #tpu.memory_space<vmem>>, vector<8x16xf32>
    %6 = arith.addf %5, %4 : vector<8x16xf32>
    %c0_4 = arith.constant 0 : index
    %c0_5 = arith.constant 0 : index
    %7 = vector.load %arg4[%c0_4, %c0_5] : memref<8x16xf32, #tpu.memory_space<vmem>>, vector<8x16xf32>
    tpu.vector_store %arg4[%c0_4, %c0_5], %6 {strides = array<i32>} : memref<8x16xf32, #tpu.memory_space<vmem>>, vector<8x16xf32>,
    %c0_i32_6 = arith.constant 0 : i32
    %8 = arith.cmpi eq, %arg1, %c0_i32_6 : i32
    %9 = arith.extui %8 : i1 to i32
    %c0_i32_7 = arith.constant 0 : i32
    %10 = arith.cmpi ne, %9, %c0_i32_7 : i32
    scf.if %10 {
      %c0_8 = arith.constant 0 : index
      %c0_9 = arith.constant 0 : index
      %11 = vector.load %arg4[%c0_8, %c0_9] : memref<8x16xf32, #tpu.memory_space<vmem>>, vector<8x16xf32>
      %cst = arith.constant dense<0.000000e+00> : vector<8xf32>
      %12 = vector.multi_reduction <add>, %11, %cst [1] : vector<8x16xf32> to vector<8xf32>
      %13 = vector.shape_cast %12 : vector<8xf32> to vector<8x1xf32>
      %c0_10 = arith.constant 0 : index
      %c0_11 = arith.constant 0 : index
      %14 = vector.load %arg3[%c0_10, %c0_11] : memref<8x1xf32, #tpu.memory_space<vmem>>, vector<8x1xf32>
      tpu.vector_store %arg3[%c0_10, %c0_11], %13 {strides = array<i32>} : memref<8x1xf32, #tpu.memory_space<vmem>>, vector<8x1xf32>,
    } else {
    }
    return
  }
  func.func @transform_0(%arg0: i32, %arg1: i32) -> (i32, i32) {
    %c0_i32 = arith.constant 0 : i32
    return %arg0, %arg1 : i32, i32
  }
  func.func @transform_1(%arg0: i32, %arg1: i32) -> (i32, i32) {
    %c0_i32 = arith.constant 0 : i32
    %c0_i32_0 = arith.constant 0 : i32
    return %arg0, %c0_i32 : i32, i32
  }
}

</mosaic_0001>

<bundles_post_ra>
// kernel: tpu_custom_call.1
= control target key start
LH: loop header
LB: loop body
LE: loop exit
PB: predicated region body
PF: predicated region fallthrough
CT: control target
= control target key end

     0   :  { %6 = vsyncpa [#allocation4], 0  ;;  %s72_s6 = smov [#allocation3]   ;;  %s99_s0 = inlined_call_operand.hbm [shape: f32[8,16], index: 0, kind: input, shape index: {}]   ;;  %s100_s1 = inlined_call_operand.vmem [shape: f32[8,1], index: 1, kind: output, shape index: {}]  }
   0x1   :  { %s13_s7 = sshll.u32 %s72_s6, 4  ;;  %s48_s10 = scalar_lea.hbm %s99_s0, 128  ;;  %s14_s7 = int_to_ptr.vmem [resolvable:$true] %s13_s7 }
   0x2   :  { %p49_p0 = scmp.ne.s32.totalorder %s99_s0, %s48_s10  ;;  %p52_p1 = scmp.lt.u32.totalorder %s48_s10, %s99_s0 }
   0x4   :  { %p54_p2 = pnand %p52_p1, %p49_p0 }
   0x6   :  { %57 = shalt.err (!%p54_p2)
}
   0x7   :  { %s58_s15 = scalar_lea.vmem %s14_s7, 128  ;;  %p63_p4 = scmp.lt.s32.totalorder %s14_s7, %s14_s7 }
   0x8   :  { %p59_p3 = scmp.ne.s32.totalorder %s14_s7, %s58_s15  ;;  %p64_p5 = scmp.lt.s32.totalorder %s58_s15, %s58_s15 }
   0xa   :  { %p65_p6 = por %p64_p5, %p63_p4 }
   0xc   :  { %p66_p7 = pnand %p65_p6, %p59_p3 }
   0xe   :  { %69 = shalt.err (!%p66_p7)
}
   0xf   :  { %16 = dma.hbm_to_vmem [thread:$0]  %s99_s0, 128, %s14_s7, [#allocation4]  }
  0x10   :  { %70 = dma.done.wait [#allocation4], 128  }
  0x11   :  { %71 = vsyncadd [#allocation4], 4294967168  ;;  %vm24_vm0 = vcmask 130048   ;;  %v73_v0 = vmov 0.0   ;;  %v26_v1 = vld [vmem:[#allocation3] sm:$0xff]  ;;  %vm39_vm1 = vcmask 7168  }
  0x12   :  { %25 = vst.msk [vmem:[#allocation2] sm:$0xff] %vm24_vm0, %v73_v0  ;;  %v27_v2 = vand.u32 2147483647, %v26_v1 }
  0x19   :  { %v28_v3 = vld [vmem:[#allocation2] sm:$0xff] }
  0x1a   :  { %v29_v4 = vadd.f32 %v28_v3, %v27_v2 }
  0x1c   :  { %31 = vst.msk [vmem:[#allocation2] sm:$0xff] %vm24_vm0, %v29_v4 }
  0x23   :  { %v35_v5 = vld [vmem:[#allocation2] sm:$0xff] }
  0x24   :  { %v36_v6 = vsel %vm24_vm0, %v35_v5, 0.0 }
  0x25   :  { %37 = vadd.xlane.f32.xlu0 %v36_v6 }
  0xb2   :  { %v38_v7 = vpop.xlane.xlu0 %37 }
  0xb3   :  { %40 = vst.msk [vmem:[%s100_s1] sm:$0xff] %vm39_vm1, %v38_v7 }
  0xb4   :  { %45 = vsyncpa [#allocation4], 1 }

</bundles_post_ra>
